<compile_context>
chip_gen: v5e
topology: v5e:2x2
jax: 0.10.0
libtpu: 0.0.40
codegen_flags: <defaults>
</compile_context>

<pallas_src>
import functools

import jax
import jax.numpy as jnp
from jax.experimental import pallas as pl
from jax.experimental.pallas import tpu as pltpu


def _round_up(x: int, m: int) -> int:
    return ((x + m - 1) // m) * m


def _decoder_kernel(emb_l_ref, emb_r_ref, w1_ref, b1_ref, w2_ref, b2_ref,
                    out_ref, *, embedding_size: int, seg: int):
    E = embedding_size

    l = emb_l_ref[...]
    r = emb_r_ref[...]

    # torch.count_nonzero(...) == 0 over the WHOLE tensor (global, not per-row),
    # done as a cheap abs+max reduce instead of int-cast + add-reduce.
    r_nonzero = jnp.max(jnp.abs(r)) > 0.0
    l_nonzero = jnp.max(jnp.abs(l)) > 0.0
    # Reference: r all-zero -> l ; elif l all-zero -> r ; else combine(l, r).
    # TODO(synk): combine_input_embeddings is abstract (raises NotImplementedError)
    # in the reference module; when both inputs are nonzero we fall back to
    # embedding_l instead of raising.
    combined = jnp.where(jnp.logical_and(r_nonzero, jnp.logical_not(l_nonzero)), r, l)

    # MLP hot path: Linear(E -> H) -> ReLU -> Linear(H -> 5*seg, columns
    # pre-padded / permuted to 128-lane-aligned segments).
    h = jnp.maximum(
        jnp.dot(combined, w1_ref[...], preferred_element_type=jnp.float32)
        + b1_ref[...], 0.0)
    nn_out = jnp.dot(h, w2_ref[...], preferred_element_type=jnp.float32) + b2_ref[...]

    # Lane-aligned segments: [edges | doubled_l | doubled_r | ratio_l | ratio_r].
    edges_seg = nn_out[:, 0:seg]
    d_l = nn_out[:, 1 * seg:1 * seg + E]
    d_r = nn_out[:, 2 * seg:2 * seg + E]
    r_l = nn_out[:, 3 * seg:3 * seg + E]
    r_r = nn_out[:, 4 * seg:4 * seg + E]

    # weighted_average(doubled, cat(combined, combined), ratio), computed per
    # half directly -> pure VPU elementwise, no concatenate / lane shuffles.
    w_l = jax.nn.sigmoid(r_l)
    w_r = jax.nn.sigmoid(r_r)
    new_l = w_l * d_l + (1.0 - w_l) * combined
    new_r = w_r * d_r + (1.0 - w_r) * combined

    # One lane-dense output slab: [edges_seg | new_l @ seg | new_r @ 2*seg].
    out_ref[:, 0:seg] = edges_seg
    out_ref[:, seg:seg + E] = new_l
    out_ref[:, 2 * seg:2 * seg + E] = new_r


def pack_params(params, embedding_size: int, edge_size: int):
    """One-time host/XLA-side repack of W2/b2 columns into 128-lane-aligned
    segments so the in-kernel splits are free views."""
    w1, b1, w2, b2 = params
    E = embedding_size
    mask_edges = 1 + edge_size
    H = w1.shape[1]
    assert w2.shape == (H, 4 * E + mask_edges)

    seg = _round_up(max(mask_edges, E), 128)
    w2p = jnp.zeros((H, 5 * seg), w2.dtype)
    b2p = jnp.zeros((1, 5 * seg), b2.dtype)

    # Segment 0: decoded_edges_with_mask columns.
    w2p = w2p.at[:, 0:mask_edges].set(w2[:, 0:mask_edges])
    b2p = b2p.at[:, 0:mask_edges].set(b2[:, 0:mask_edges])
    # Segments 1..4: doubled_l, doubled_r, ratio_l, ratio_r (each E columns).
    for i in range(4):
        src = mask_edges + i * E
        dst = (i + 1) * seg
        w2p = w2p.at[:, dst:dst + E].set(w2[:, src:src + E])
        b2p = b2p.at[:, dst:dst + E].set(b2[:, src:src + E])

    return (w1, b1, w2p, b2p, seg)


def single_input_memory_edge_decoder(emb_l, emb_r, packed_params,
                                     *, embedding_size: int, edge_size: int):
    """Whole forward pass in one grid-less Pallas kernel; all operands live in
    VMEM as full arrays (tiny shapes, no pipelining needed)."""
    w1, b1, w2p, b2p, seg = packed_params
    B, E = emb_l.shape
    assert E == embedding_size
    mask_edges = 1 + edge_size

    kernel = functools.partial(_decoder_kernel, embedding_size=E, seg=seg)
    vmem = pl.BlockSpec(memory_space=pltpu.MemorySpace.VMEM)

    out = pl.pallas_call(
        kernel,
        in_specs=[vmem] * 6,
        out_specs=vmem,
        out_shape=jax.ShapeDtypeStruct((B, 3 * seg), jnp.float32),
    )(emb_l, emb_r, w1, b1, w2p, b2p)

    decoded_edges_with_mask = out[:, :mask_edges]
    new_embedding_l = out[:, seg:seg + E]
    new_embedding_r = out[:, 2 * seg:2 * seg + E]
    return decoded_edges_with_mask, new_embedding_l, new_embedding_r


def init_params(key, embedding_size: int, edge_size: int, hidden: int):
    """Deterministic synthetic parameters (shapes match the nn.Sequential in the
    reference __init__: Linear(E, H) -> ReLU -> Linear(H, 4E+1+edge))."""
    E = embedding_size
    O = 4 * E + 1 + edge_size
    k1, k2, k3, k4 = jax.random.split(key, 4)
    w1 = jax.random.normal(k1, (E, hidden), jnp.float32) * (1.0 / jnp.sqrt(E))
    b1 = jax.random.normal(k2, (1, hidden), jnp.float32) * 0.01
    w2 = jax.random.normal(k3, (hidden, O), jnp.float32) * (1.0 / jnp.sqrt(hidden))
    b2 = jax.random.normal(k4, (1, O), jnp.float32) * 0.01
    return w1, b1, w2, b2


def _reference(emb_l, emb_r, params, embedding_size, edge_size):
    """Pure-JAX reference of the same math (using the ORIGINAL unpacked params)."""
    w1, b1, w2, b2 = params
    r_nz = jnp.max(jnp.abs(emb_r)) > 0.0
    l_nz = jnp.max(jnp.abs(emb_l)) > 0.0
    combined = jnp.where(jnp.logical_and(r_nz, jnp.logical_not(l_nz)), emb_r, emb_l)
    h = jnp.maximum(combined @ w1 + b1, 0.0)
    nn_out = h @ w2 + b2
    m = 1 + edge_size
    E = embedding_size
    edges = nn_out[:, :m]
    doubled = nn_out[:, m:m + 2 * E]
    ratio = nn_out[:, m + 2 * E:]
    w = jax.nn.sigmoid(ratio)
    blended = w * doubled + (1 - w) * jnp.concatenate([combined, combined], -1)
    return edges, blended[:, :E], blended[:, E:]


if __name__ == "__main__":
    EMBEDDING_SIZE = 32
    EDGE_SIZE = 7
    HIDDEN = 64
    BATCH = 8

    key = jax.random.PRNGKey(0)
    k_l, k_r, k_params = jax.random.split(key, 3)

    params = init_params(k_params, EMBEDDING_SIZE, EDGE_SIZE, HIDDEN)
    packed = pack_params(params, EMBEDDING_SIZE, EDGE_SIZE)

    # Case 1 ("single input", right embedding all zero -> combined = embedding_l).
    embedding_l = jax.random.normal(k_l, (BATCH, EMBEDDING_SIZE), jnp.float32)
    embedding_r = jnp.zeros((BATCH, EMBEDDING_SIZE), jnp.float32)

    edges, new_l, new_r = single_input_memory_edge_decoder(
        embedding_l, embedding_r, packed,
        embedding_size=EMBEDDING_SIZE, edge_size=EDGE_SIZE)
    jax.block_until_ready((edges, new_l, new_r))

    assert edges.shape == (BATCH, 1 + EDGE_SIZE)
    assert new_l.shape == (BATCH, EMBEDDING_SIZE)
    assert new_r.shape == (BATCH, EMBEDDING_SIZE)

    ref_e, ref_l, ref_r = _reference(embedding_l, embedding_r, params,
                                     EMBEDDING_SIZE, EDGE_SIZE)
    assert jnp.allclose(edges, ref_e, atol=1e-4)
    assert jnp.allclose(new_l, ref_l, atol=1e-4)
    assert jnp.allclose(new_r, ref_r, atol=1e-4)

    # Case 2 (left all zero, right nonzero -> combined = embedding_r).
    emb_l2 = jnp.zeros((BATCH, EMBEDDING_SIZE), jnp.float32)
    emb_r2 = jax.random.normal(k_r, (BATCH, EMBEDDING_SIZE), jnp.float32)
    edges2, new_l2, new_r2 = single_input_memory_edge_decoder(
        emb_l2, emb_r2, packed,
        embedding_size=EMBEDDING_SIZE, edge_size=EDGE_SIZE)
    jax.block_until_ready((edges2, new_l2, new_r2))
    ref_e2, ref_l2, ref_r2 = _reference(emb_l2, emb_r2, params,
                                        EMBEDDING_SIZE, EDGE_SIZE)
    assert jnp.allclose(edges2, ref_e2, atol=1e-4)
    assert jnp.allclose(new_l2, ref_l2, atol=1e-4)
    assert jnp.allclose(new_r2, ref_r2, atol=1e-4)

    print("KERNEL_OK")
</pallas_src>

<mosaic_0001>
module attributes {stable_mosaic.version = 11 : i64} {
  func.func @_decoder_kernel(%arg0: memref<8x32xf32, #tpu.memory_space<vmem>>, %arg1: memref<8x32xf32, #tpu.memory_space<vmem>>, %arg2: memref<32x64xf32, #tpu.memory_space<vmem>>, %arg3: memref<1x64xf32, #tpu.memory_space<vmem>>, %arg4: memref<64x640xf32, #tpu.memory_space<vmem>>, %arg5: memref<1x640xf32, #tpu.memory_space<vmem>>, %arg6: memref<8x384xf32, #tpu.memory_space<vmem>>) attributes {dimension_semantics = [], scalar_prefetch = 0 : i64, scratch_operands = 0 : i64, tpu.core_type = #tpu.core_type<tc>} {
    %c0 = arith.constant 0 : index
    %c0_0 = arith.constant 0 : index
    %0 = vector.load %arg0[%c0, %c0_0] : memref<8x32xf32, #tpu.memory_space<vmem>>, vector<8x32xf32>
    %c0_1 = arith.constant 0 : index
    %c0_2 = arith.constant 0 : index
    %1 = vector.load %arg1[%c0_1, %c0_2] : memref<8x32xf32, #tpu.memory_space<vmem>>, vector<8x32xf32>
    %2 = math.absf %1 : vector<8x32xf32>
    %3 = vector.shape_cast %2 : vector<8x32xf32> to vector<1x8x32xf32>
    %cst = arith.constant dense<0xFF800000> : vector<1xf32>
    %4 = vector.multi_reduction <maximumf>, %3, %cst [1, 2] : vector<1x8x32xf32> to vector<1xf32>
    %5 = vector.shape_cast %4 : vector<1xf32> to vector<1x1x1xf32>
    %6 = vector.extract %5[0, 0, 0] : f32 from vector<1x1x1xf32>
    %cst_3 = arith.constant 0.000000e+00 : f32
    %7 = arith.cmpf ogt, %6, %cst_3 : f32
    %8 = math.absf %0 : vector<8x32xf32>
    %9 = vector.shape_cast %8 : vector<8x32xf32> to vector<1x8x32xf32>
    %cst_4 = arith.constant dense<0xFF800000> : vector<1xf32>
    %10 = vector.multi_reduction <maximumf>, %9, %cst_4 [1, 2] : vector<1x8x32xf32> to vector<1xf32>
    %11 = vector.shape_cast %10 : vector<1xf32> to vector<1x1x1xf32>
    %12 = vector.extract %11[0, 0, 0] : f32 from vector<1x1x1xf32>
    %cst_5 = arith.constant 0.000000e+00 : f32
    %13 = arith.cmpf ogt, %12, %cst_5 : f32
    %true = arith.constant true
    %14 = arith.xori %13, %true : i1
    %15 = arith.andi %7, %14 : i1
    %16 = arith.select %15, %1, %0 : vector<8x32xf32>
    %c0_6 = arith.constant 0 : index
    %c0_7 = arith.constant 0 : index
    %17 = vector.load %arg2[%c0_6, %c0_7] : memref<32x64xf32, #tpu.memory_space<vmem>>, vector<32x64xf32>
    %cst_8 = arith.constant dense<0.000000e+00> : vector<8x64xf32>
    %18 = tpu.matmul %16, %17, %cst_8 {dimension_numbers = #tpu.dot_dimension_numbers<[1], [0], [0], [1], [0, 0, 1, 1], [], []>} : vector<8x32xf32>, vector<32x64xf32>, vector<8x64xf32> -> vector<8x64xf32>
    %c0_9 = arith.constant 0 : index
    %c0_10 = arith.constant 0 : index
    %19 = vector.load %arg3[%c0_9, %c0_10] : memref<1x64xf32, #tpu.memory_space<vmem>>, vector<1x64xf32>
    %20 = vector.broadcast %19 : vector<1x64xf32> to vector<8x64xf32>
    %21 = arith.addf %18, %20 : vector<8x64xf32>
    %cst_11 = arith.constant 0.000000e+00 : f32
    %22 = vector.broadcast %cst_11 : f32 to vector<8x64xf32>
    %23 = arith.maximumf %21, %22 : vector<8x64xf32>
    %c0_12 = arith.constant 0 : index
    %c0_13 = arith.constant 0 : index
    %24 = vector.load %arg4[%c0_12, %c0_13] : memref<64x640xf32, #tpu.memory_space<vmem>>, vector<64x640xf32>
    %cst_14 = arith.constant dense<0.000000e+00> : vector<8x640xf32>
    %25 = tpu.matmul %23, %24, %cst_14 {dimension_numbers = #tpu.dot_dimension_numbers<[1], [0], [0], [1], [0, 0, 1, 1], [], []>} : vector<8x64xf32>, vector<64x640xf32>, vector<8x640xf32> -> vector<8x640xf32>
    %c0_15 = arith.constant 0 : index
    %c0_16 = arith.constant 0 : index
    %26 = vector.load %arg5[%c0_15, %c0_16] : memref<1x640xf32, #tpu.memory_space<vmem>>, vector<1x640xf32>
    %27 = vector.broadcast %26 : vector<1x640xf32> to vector<8x640xf32>
    %28 = arith.addf %25, %27 : vector<8x640xf32>
    %29 = vector.extract_strided_slice %28 {offsets = [0, 0], sizes = [8, 128], strides = [1, 1]} : vector<8x640xf32> to vector<8x128xf32>
    %30 = vector.extract_strided_slice %28 {offsets = [0, 128], sizes = [8, 32], strides = [1, 1]} : vector<8x640xf32> to vector<8x32xf32>
    %31 = vector.extract_strided_slice %28 {offsets = [0, 256], sizes = [8, 32], strides = [1, 1]} : vector<8x640xf32> to vector<8x32xf32>
    %32 = vector.extract_strided_slice %28 {offsets = [0, 384], sizes = [8, 32], strides = [1, 1]} : vector<8x640xf32> to vector<8x32xf32>
    %33 = vector.extract_strided_slice %28 {offsets = [0, 512], sizes = [8, 32], strides = [1, 1]} : vector<8x640xf32> to vector<8x32xf32>
    %34 = arith.negf %32 : vector<8x32xf32>
    %35 = math.exp %34 : vector<8x32xf32>
    %cst_17 = arith.constant 1.000000e+00 : f32
    %36 = vector.broadcast %cst_17 : f32 to vector<8x32xf32>
    %37 = arith.addf %36, %35 : vector<8x32xf32>
    %38 = arith.divf %36, %37 : vector<8x32xf32>
    %39 = arith.negf %33 : vector<8x32xf32>
    %40 = math.exp %39 : vector<8x32xf32>
    %cst_18 = arith.constant 1.000000e+00 : f32
    %41 = vector.broadcast %cst_18 : f32 to vector<8x32xf32>
    %42 = arith.addf %41, %40 : vector<8x32xf32>
    %43 = arith.divf %41, %42 : vector<8x32xf32>
    %44 = arith.mulf %38, %30 : vector<8x32xf32>
    %cst_19 = arith.constant 1.000000e+00 : f32
    %45 = vector.broadcast %cst_19 : f32 to vector<8x32xf32>
    %46 = arith.subf %45, %38 : vector<8x32xf32>
    %47 = arith.mulf %46, %16 : vector<8x32xf32>
    %48 = arith.addf %44, %47 : vector<8x32xf32>
    %49 = arith.mulf %43, %31 : vector<8x32xf32>
    %cst_20 = arith.constant 1.000000e+00 : f32
    %50 = vector.broadcast %cst_20 : f32 to vector<8x32xf32>
    %51 = arith.subf %50, %43 : vector<8x32xf32>
    %52 = arith.mulf %51, %16 : vector<8x32xf32>
    %53 = arith.addf %49, %52 : vector<8x32xf32>
    %c0_21 = arith.constant 0 : index
    %c0_22 = arith.constant 0 : index
    %54 = vector.load %arg6[%c0_21, %c0_22] : memref<8x384xf32, #tpu.memory_space<vmem>>, vector<8x128xf32>
    tpu.vector_store %arg6[%c0_21, %c0_22], %29 {strides = array<i32>} : memref<8x384xf32, #tpu.memory_space<vmem>>, vector<8x128xf32>,
    %c0_23 = arith.constant 0 : index
    %c128 = arith.constant 128 : index
    %55 = vector.load %arg6[%c0_23, %c128] : memref<8x384xf32, #tpu.memory_space<vmem>>, vector<8x32xf32>
    tpu.vector_store %arg6[%c0_23, %c128], %48 {strides = array<i32>} : memref<8x384xf32, #tpu.memory_space<vmem>>, vector<8x32xf32>,
    %c0_24 = arith.constant 0 : index
    %c256 = arith.constant 256 : index
    %56 = vector.load %arg6[%c0_24, %c256] : memref<8x384xf32, #tpu.memory_space<vmem>>, vector<8x32xf32>
    tpu.vector_store %arg6[%c0_24, %c256], %53 {strides = array<i32>} : memref<8x384xf32, #tpu.memory_space<vmem>>, vector<8x32xf32>,
    return
  }
}

</mosaic_0001>

<bundles_post_ra>
// kernel: tpu_custom_call.1
= control target key start
LH: loop header
LB: loop body
LE: loop exit
PB: predicated region body
PF: predicated region fallthrough
CT: control target
= control target key end

     0   :  { %11 = vsyncpa [#allocation3], 0  ;;  %s654_s0 = inlined_call_operand.hbm [shape: f32[8,32], index: 0, kind: input, shape index: {}]   ;;  %s655_s1 = inlined_call_operand.hbm [shape: f32[8,32], index: 1, kind: input, shape index: {}]   ;;  %s656_s2 = inlined_call_operand.hbm [shape: f32[32,64], index: 2, kind: input, shape index: {}]   ;;  %s657_s3 = inlined_call_operand.vmem [shape: f32[1,64], index: 3, kind: input, shape index: {}]   ;;  %s658_s4 = inlined_call_operand.hbm [shape: f32[64,640], index: 4, kind: input, shape index: {}]   ;;  %s659_s5 = inlined_call_operand.hbm [shape: f32[1,640], index: 5, kind: input, shape index: {}]   ;;  %s660_s6 = inlined_call_operand.hbm [shape: f32[8,384], index: 6, kind: output, shape index: {}]  }
   0x1   :  { %12 = vsyncpa [#allocation6], 0 }
   0x2   :  { %13 = vsyncpa [#allocation9], 0  ;;  %s31_s23 = sshll.u32 %s655_s1, 4  ;;  %s32_s23 = int_to_ptr.hbm [resolvable:$true] %s31_s23 }
   0x3   :  { %14 = vsyncpa [#allocation4], 0  ;;  %s570_s24 = smov [#allocation5]   ;;  %s56_s28 = sshll.u32 %s658_s4, 4  ;;  %s57_s28 = int_to_ptr.hbm [resolvable:$true] %s56_s28 }
   0x4   :  { %s33_s25 = sshll.u32 %s570_s24, 4  ;;  %s571_s29 = smov [#allocation8]   ;;  %s34_s25 = int_to_ptr.vmem [resolvable:$true] %s33_s25 }
   0x5   :  { %36 = dma.hbm_to_vmem [thread:$0]  %s32_s23, 128, %s34_s25, [#allocation6]  }
   0x6   :  { %s58_s30 = sshll.u32 %s571_s29, 4  ;;  %s572_s7 = smov 640   ;;  %s59_s30 = int_to_ptr.vmem [resolvable:$true] %s58_s30 }
   0x7   :  { %s573_s8 = smov 40   ;;  %s20_s1 = sshll.u32 %s654_s0, 4  ;;  %s21_s1 = int_to_ptr.hbm [resolvable:$true] %s20_s1 }
   0x8   :  { %64 = dma.hbm_to_vmem [thread:$0]  %s57_s28, 5120, %s59_s30, [#allocation9], %s572_s7, %s572_s7, %s573_s8  }
   0x9   :  { %s574_s11 = smov [#allocation2]   ;;  %s41_s4 = sshll.u32 %s656_s2, 4  ;;  %s42_s4 = int_to_ptr.hbm [resolvable:$true] %s41_s4 }
   0xa   :  { %s22_s12 = sshll.u32 %s574_s11, 4  ;;  %s575_s15 = smov [#allocation7]   ;;  %s23_s12 = int_to_ptr.vmem [resolvable:$true] %s22_s12 }
   0xb   :  { %25 = dma.hbm_to_vmem [thread:$0]  %s21_s1, 128, %s23_s12, [#allocation3]  }
   0xc   :  { %s43_s16 = sshll.u32 %s575_s15, 4  ;;  %s576_s17 = smov 128   ;;  %s44_s16 = int_to_ptr.vmem [resolvable:$true] %s43_s16 }
   0xd   :  { %s577_s18 = smov 8   ;;  %s70_s0 = sshll.u32 %s659_s5, 4  ;;  %s71_s0 = int_to_ptr.hbm [resolvable:$true] %s70_s0 }
   0xe   :  { %49 = dma.hbm_to_vmem [thread:$0]  %s42_s4, 512, %s44_s16, [#allocation6], %s576_s17, %s576_s17, %s577_s18  }
   0xf   :  { %s578_s21 = smov [#allocation10]  }
  0x10   :  { %s72_s22 = sshll.u32 %s578_s21, 4  ;;  %s73_s22 = int_to_ptr.vmem [resolvable:$true] %s72_s22 }
  0x11   :  { %75 = dma.hbm_to_vmem [thread:$0]  %s71_s0, 80, %s73_s22, [#allocation9]  }
  0x12   :  { %562 = dma.done.wait [#allocation3], 128  }
  0x13   :  { %563 = vsyncadd [#allocation3], 4294967168 }
  0x14   :  { %564 = dma.done.wait [#allocation6], 640  }
  0x15   :  { %565 = vsyncadd [#allocation6], 4294966656 }
  0x16   :  { %566 = dma.done.wait [#allocation9], 5200  }
  0x17   :  { %567 = vsyncadd [#allocation9], 4294962096  ;;  %v630_v0 = vld [vmem:[#allocation5] sm:$0xff]  ;;  %vm99_vm0 = vcmask 261120   ;;  %v633_v2 = vld [vmem:[#allocation2] sm:$0xff]  ;;  %vm214_vm2 = vcmask 523264  }
  0x18   :  { %v98_v1 = vand.u32 2147483647, %v630_v0  ;;  %v111_v4 = vand.u32 2147483647, %v633_v2  ;;  %v133_v20 = vld [vmem:[#allocation7 + $0x18] sm:$0xff]  ;;  %v132_v21 = vld [vmem:[#allocation7 + $0x10] sm:$0xff] }
  0x19   :  { %153 = vmatpush.msra.mxu0 %v133_v20  ;;  %v131_v22 = vld [vmem:[#allocation7 + $0x8] sm:$0xff]  ;;  %v130_v23 = vld [vmem:[#allocation7] sm:$0xff]  ;;  %v197_v24 = vld [vmem:[#allocation8 + $0x118] sm:$0xff]  ;;  %s374_s29 = sshll.u32 %s660_s6, 4  ;;  %s375_s29 = int_to_ptr.hbm [resolvable:$true] %s374_s29 }
  0x1a   :  { %v100_v3 = vsel %vm99_vm0, %v98_v1, -inf  ;;  %v112_v5 = vsel %vm99_vm0, %v111_v4, -inf  ;;  %v192_v25 = vld [vmem:[#allocation8 + $0xf0] sm:$0xff]  ;;  %226 = vmatpush.msra.mxu1 %v197_v24  ;;  %v198_v26 = vld [vmem:[#allocation8 + $0x120] sm:$0xff]  ;;  %v199_v27 = vld [vmem:[#allocation8 + $0x128] sm:$0xff] }
  0x1b   :  { %101 = vmax.xlane.f32.xlu0 %v100_v3  ;;  %154 = vmatpush.msra.mxu0 %v132_v21  ;;  %v187_v28 = vld [vmem:[#allocation8 + $0xc8] sm:$0xff]  ;;  %v200_v29 = vld [vmem:[#allocation8 + $0x130] sm:$0xff]  ;;  %v193_v30 = vld [vmem:[#allocation8 + $0xf8] sm:$0xff] }
  0x1c   :  { %246 = vmatpush.msra.mxu2 %v198_v26  ;;  %266 = vmatpush.msra.mxu3 %v199_v27  ;;  %v182_v31 = vld [vmem:[#allocation8 + $0xa0] sm:$0xff]  ;;  %v195_v33 = vld [vmem:[#allocation8 + $0x108] sm:$0xff]  ;;  %v188_v34 = vld [vmem:[#allocation8 + $0xd0] sm:$0xff] }
  0x1d   :  { %155 = vmatpush.msra.mxu0 %v131_v22  ;;  %227 = vmatpush.msra.mxu1 %v192_v25  ;;  %v194_v32 = vld [vmem:[#allocation8 + $0x100] sm:$0xff]  ;;  %v189_v35 = vld [vmem:[#allocation8 + $0xd8] sm:$0xff]  ;;  %v183_v37 = vld [vmem:[#allocation8 + $0xa8] sm:$0xff] }
  0x1e   :  { %247 = vmatpush.msra.mxu2 %v193_v30  ;;  %267 = vmatpush.msra.mxu3 %v194_v32  ;;  %v190_v36 = vld [vmem:[#allocation8 + $0xe0] sm:$0xff]  ;;  %v184_v38 = vld [vmem:[#allocation8 + $0xb0] sm:$0xff]  ;;  %v177_v39 = vld [vmem:[#allocation8 + $0x78] sm:$0xff] }
  0x1f   :  { %156 = vmatpush.msra.mxu0 %v130_v23  ;;  %228 = vmatpush.msra.mxu1 %v187_v28  ;;  %v185_v40 = vld [vmem:[#allocation8 + $0xb8] sm:$0xff]  ;;  %v178_v41 = vld [vmem:[#allocation8 + $0x80] sm:$0xff]  ;;  %v179_v42 = vld [vmem:[#allocation8 + $0x88] sm:$0xff] }
  0x20   :  { %248 = vmatpush.msra.mxu2 %v188_v34  ;;  %268 = vmatpush.msra.mxu3 %v189_v35  ;;  %v172_v43 = vld [vmem:[#allocation8 + $0x50] sm:$0xff]  ;;  %v167_v45 = vld [vmem:[#allocation8 + $0x28] sm:$0xff]  ;;  %v162_v46 = vld [vmem:[#allocation8] sm:$0xff] }
  0x21   :  { %286 = vmatpush.msrb.mxu0 %v200_v29  ;;  %229 = vmatpush.msra.mxu1 %v182_v31  ;;  %v180_v44 = vld [vmem:[#allocation8 + $0x90] sm:$0xff]  ;;  %v201_v47 = vld [vmem:[#allocation8 + $0x138] sm:$0xff]  ;;  %v174_v51 = vld [vmem:[#allocation8 + $0x60] sm:$0xff] }
  0x22   :  { %249 = vmatpush.msra.mxu2 %v183_v37  ;;  %269 = vmatpush.msra.mxu3 %v184_v38  ;;  %v173_v50 = vld [vmem:[#allocation8 + $0x58] sm:$0xff]  ;;  %v175_v52 = vld [vmem:[#allocation8 + $0x68] sm:$0xff]  ;;  %v196_v53 = vld [vmem:[#allocation8 + $0x110] sm:$0xff] }
  0x23   :  { %113 = vmax.xlane.f32.xlu0 %v112_v5  ;;  %287 = vmatpush.msrb.mxu0 %v195_v33  ;;  %v168_v54 = vld [vmem:[#allocation8 + $0x30] sm:$0xff]  ;;  %v169_v55 = vld [vmem:[#allocation8 + $0x38] sm:$0xff]  ;;  %v170_v56 = vld [vmem:[#allocation8 + $0x40] sm:$0xff] }
  0x24   :  { %230 = vmatpush.msra.mxu1 %v177_v39  ;;  %250 = vmatpush.msra.mxu2 %v178_v41  ;;  %v191_v57 = vld [vmem:[#allocation8 + $0xe8] sm:$0xff]  ;;  %v164_v59 = vld [vmem:[#allocation8 + $0x10] sm:$0xff]  ;;  %v165_v60 = vld [vmem:[#allocation8 + $0x18] sm:$0xff] }
  0x25   :  { %288 = vmatpush.msrb.mxu0 %v190_v36  ;;  %270 = vmatpush.msra.mxu3 %v179_v42  ;;  %v163_v58 = vld [vmem:[#allocation8 + $0x8] sm:$0xff]  ;;  %v186_v61 = vld [vmem:[#allocation8 + $0xc0] sm:$0xff]  ;;  %v181_v62 = vld [vmem:[#allocation8 + $0x98] sm:$0xff] }
  0x26   :  { %231 = vmatpush.msra.mxu1 %v172_v43  ;;  %251 = vmatpush.msra.mxu2 %v173_v50  ;;  %v176_v63 = vld [vmem:[#allocation8 + $0x70] sm:$0xff]  ;;  %v166_v1 = vld [vmem:[#allocation8 + $0x20] sm:$0xff] }
  0x27   :  { %289 = vmatpush.msrb.mxu0 %v185_v40  ;;  %271 = vmatpush.msra.mxu3 %v174_v51 }
  0x28   :  { %232 = vmatpush.msra.mxu1 %v167_v45  ;;  %252 = vmatpush.msra.mxu2 %v168_v54 }
  0x29   :  { %290 = vmatpush.msrb.mxu0 %v180_v44  ;;  %272 = vmatpush.msra.mxu3 %v169_v55 }
  0x2a   :  { %233 = vmatpush.msra.mxu1 %v162_v46  ;;  %253 = vmatpush.msra.mxu2 %v163_v58 }
  0x2b   :  { %291 = vmatpush.msrb.mxu0 %v175_v52  ;;  %273 = vmatpush.msra.mxu3 %v164_v59 }
  0x2c   :  { %306 = vmatpush.msrb.mxu1 %v201_v47 }
  0x2d   :  { %292 = vmatpush.msrb.mxu0 %v170_v56 }
  0x2e   :  { %307 = vmatpush.msrb.mxu1 %v196_v53 }
  0x2f   :  { %293 = vmatpush.msrb.mxu0 %v165_v60 }
  0x30   :  { %308 = vmatpush.msrb.mxu1 %v191_v57 }
  0x32   :  { %309 = vmatpush.msrb.mxu1 %v186_v61 }
  0x34   :  { %310 = vmatpush.msrb.mxu1 %v181_v62 }
  0x36   :  { %311 = vmatpush.msrb.mxu1 %v176_v63 }
  0x8e   :  { %v102_v6 = vpop.xlane.xlu0 %101 }
  0x8f   :  { %v103_v7 = vrot.slane %v102_v6, 4 }
  0x91   :  { %v104_v8 = vmax.f32 %v102_v6, %v103_v7  ;;  %v202_v6 = vld [vmem:[#allocation10] sm:$0x1f] }
  0x92   :  { %v204_v7 = vperm.slane %v202_v6, 0  ;;  %v205_v29 = vperm.slane %v202_v6, 1  ;;  %v206_v44 = vperm.slane %v202_v6, 2 }
  0x93   :  { %v105_v9 = vrot.slane %v104_v8, 2 }
  0x95   :  { %v106_v10 = vmax.f32 %v104_v8, %v105_v9  ;;  %v207_v8 = vperm.slane %v202_v6, 3 }
  0x96   :  { %v114_v11 = vpop.xlane.xlu0 %113 }
  0x97   :  { %v115_v12 = vrot.slane %v114_v11, 4  ;;  %v107_v13 = vrot.slane %v106_v10, 1 }
  0x99   :  { %v116_v14 = vmax.f32 %v114_v11, %v115_v12  ;;  %v108_v15 = vmax.f32 %v106_v10, %v107_v13 }
  0x9b   :  { %v117_v16 = vrot.slane %v116_v14, 2  ;;  %395 = vpush %v108_v15 }
  0x9d   :  { %v118_v17 = vmax.f32 %v116_v14, %v117_v16  ;;  %v208_v14 = vperm.slane %v202_v6, 4 }
  0x9f   :  { %v119_v18 = vrot.slane %v118_v17, 1 }
  0xa1   :  { %v120_v19 = vmax.f32 %v118_v17, %v119_v18 }
  0xa3   :  { %397 = vpush %v120_v19 }
  0xcc   :  { %s396_s2 = spop %395 }
  0xcd   :  { %p110_p1 = scmp.gt.f32.partialorder %s396_s2, 0.0 }
  0xd4   :  { %s398_s5 = spop %397 }
  0xd5   :  { %p122_p0 = scmp.gt.f32.partialorder %s398_s5, 0.0 }
  0xd7   :  { %p123_p2 = pneg %p122_p0 }
  0xd9   :  { %p124_p3 = pnand %p123_p2, %p110_p1 }
  0xdb   :  { %s386_s23 = scalar_select %p124_p3, 0, 1 }
  0xdd   :  { %v127_v48 = vstv %s386_s23 }
  0xde   :  { %vm128_vm1 = vcmp.eq.s32.totalorder %v127_v48, 1 }
  0xdf   :  { %v640_v49 = vsel %vm128_vm1, %v630_v0, %v633_v2  ;;  %v171_v0 = vld [vmem:[#allocation8 + $0x48] sm:$0xff]  ;;  %v409_v2 = vld [vmem:[%s657_s3] ss:$0 sm:$0xff]  ;;  %s579_s3 = smov [#allocation11]  }
  0xe0   :  { %387 = vmatmul.msk.f32.vlgmr.msra.gmra.mxu0 %vm99_vm0, %v640_v49  ;;  %312 = vmatpush.msrb.mxu1 %v171_v0  ;;  %s372_s26 = sshll.u32 %s579_s3, 4  ;;  %s373_s26 = int_to_ptr.vmem [resolvable:$true] %s372_s26 }
  0xe2   :  { %313 = vmatpush.msrb.mxu1 %v166_v1 }
 0x15d   :  { %v158_v3 = vpop.f32.mrf.mxu0 }
 0x15e   :  { %v159_v4 = vadd.f32 %v409_v2, %v158_v3 }
 0x160   :  { %v161_v5 = vmax.f32 %v159_v4, 0.0 }
 0x162   :  { %388 = vmatmul.msk.f32.vlgmr.msra.gmra.mxu1 %vm214_vm2, %v161_v5  ;;  %389 = vmatmul.msk.f32.vlgmr.msra.gmra.mxu2 %vm214_vm2, %v161_v5 }
 0x163   :  { %390 = vmatmul.msk.f32.vlgmr.msra.gmra.mxu3 %vm214_vm2, %v161_v5  ;;  %391 = vmatmul.msk.f32.vlgmr.msrb.gmra.mxu0 %vm214_vm2, %v161_v5 }
 0x16a   :  { %392 = vmatmul.msk.f32.vlgmr.msrb.gmra.mxu1 %vm214_vm2, %v161_v5 }
 0x1df   :  { %v235_v9 = vpop.f32.mrf.mxu1 }
 0x1e0   :  { %v236_v10 = vadd.f32 %v235_v9, %v204_v7  ;;  %v295_v11 = vpop.f32.mrf.mxu0 }
 0x1e1   :  { %v296_v12 = vadd.f32 %v295_v11, %v207_v8 }
 0x1e2   :  { %364 = vst [vmem:[#allocation11] sm:$0xff] %v236_v10 }
 0x1e3   :  { %v393_v13 = vmul.f32 -1.442695, %v296_v12 }
 0x1e5   :  { %410 = vpow2.f32 %v393_v13  ;;  %v255_v31 = vpop.f32.mrf.mxu2 }
 0x1e6   :  { %v256_v37 = vadd.f32 %v255_v31, %v205_v29  ;;  %v275_v47 = vpop.f32.mrf.mxu3 }
 0x1e7   :  { %v315_v15 = vpop.f32.mrf.mxu1  ;;  %v276_v52 = vadd.f32 %v275_v47, %v206_v44 }
 0x1e8   :  { %v316_v16 = vadd.f32 %v315_v15, %v208_v14 }
 0x1ea   :  { %v394_v17 = vmul.f32 -1.442695, %v316_v16 }
 0x1eb   :  { %v411_v18 = vpop.eup %410 }
 0x1ec   :  { %v321_v19 = vadd.f32 1.0, %v411_v18  ;;  %412 = vpow2.f32 %v394_v17 }
 0x1ee   :  { %414 = vrcp.f32 %v321_v19  ;;  %v333_v25 = vand.u32 2147483648, %v321_v19  ;;  %v331_v27 = vand.u32 2147483647, %v321_v19  ;;  %vm327_vm4 = vweird.f32 %v321_v19 }
 0x1f0   :  { %v334_v32 = vor.u32 1.1754944e-38, %v333_v25  ;;  %vm332_vm6 = vcmp.eq.f32.partialorder %v331_v27, 8.507059e+37 }
 0x1f2   :  { %v413_v20 = vpop.eup %412 }
 0x1f3   :  { %v340_v21 = vadd.f32 1.0, %v413_v20 }
 0x1f4   :  { %v415_v22 = vpop.eup %414 }
 0x1f5   :  { %v323_v23 = vmul.f32 %v415_v22, %v321_v19  ;;  %416 = vrcp.f32 %v340_v21  ;;  %vm328_vm3 = vweird.f32 %v415_v22  ;;  %v352_v39 = vand.u32 2147483648, %v340_v21 }
 0x1f6   :  { %vm329_vm5 = vmor %vm327_vm4, %vm328_vm3  ;;  %v350_v41 = vand.u32 2147483647, %v340_v21  ;;  %vm346_vm8 = vweird.f32 %v340_v21 }
 0x1f7   :  { %v324_v24 = vsub.f32 1.0, %v323_v23  ;;  %v353_v48 = vor.u32 1.1754944e-38, %v352_v39 }
 0x1f8   :  { %vm351_vm10 = vcmp.eq.f32.partialorder %v350_v41, 8.507059e+37 }
 0x1f9   :  { %v325_v26 = vmul.f32 %v415_v22, %v324_v24 }
 0x1fb   :  { %v417_v28 = vpop.eup %416  ;;  %v326_v30 = vadd.f32 %v415_v22, %v325_v26 }
 0x1fc   :  { %v342_v33 = vmul.f32 %v417_v28, %v340_v21  ;;  %vm347_vm7 = vweird.f32 %v417_v28 }
 0x1fd   :  { %v330_v34 = vsel %vm329_vm5, %v415_v22, %v326_v30  ;;  %vm348_vm9 = vmor %vm346_vm8, %vm347_vm7 }
 0x1fe   :  { %v335_v35 = vsel %vm332_vm6, %v334_v32, %v330_v34  ;;  %v343_v36 = vsub.f32 1.0, %v342_v33 }
 0x1ff   :  { %v357_v38 = vsub.f32 1.0, %v335_v35  ;;  %v356_v42 = vmul.f32 %v335_v35, %v256_v37 }
 0x200   :  { %v344_v40 = vmul.f32 %v417_v28, %v343_v36 }
 0x201   :  { %v358_v43 = vmul.f32 %v357_v38, %v640_v49 }
 0x202   :  { %v345_v45 = vadd.f32 %v417_v28, %v344_v40 }
 0x203   :  { %v359_v46 = vadd.f32 %v358_v43, %v356_v42 }
 0x204   :  { %v349_v50 = vsel %vm348_vm9, %v417_v28, %v345_v45 }
 0x205   :  { %365 = vst.msk [vmem:[#allocation11 + $0x8] sm:$0xff] %vm99_vm0, %v359_v46  ;;  %v354_v51 = vsel %vm351_vm10, %v353_v48, %v349_v50 }
 0x206   :  { %v361_v53 = vsub.f32 1.0, %v354_v51  ;;  %v360_v54 = vmul.f32 %v354_v51, %v276_v52 }
 0x208   :  { %v362_v55 = vmul.f32 %v361_v53, %v640_v49 }
 0x20a   :  { %v363_v56 = vadd.f32 %v362_v55, %v360_v54 }
 0x20c   :  { %366 = vst.msk [vmem:[#allocation11 + $0x10] sm:$0xff] %vm99_vm0, %v363_v56 }
 0x20d   :  { %377 = dma.vmem_to_hbm [thread:$0]  %s373_s26, 384, %s375_s29, [#allocation4]  }
 0x20e   :  { %568 = dma.done.wait [#allocation4], 384  }
 0x20f   :  { %569 = vsyncadd [#allocation4], 4294966912 }
 0x210   :  { %382 = vsyncpa [#allocation3], 1 }
 0x211   :  { %383 = vsyncpa [#allocation6], 1 }
 0x212   :  { %384 = vsyncpa [#allocation9], 1 }
 0x213   :  { %385 = vsyncpa [#allocation4], 1 }

</bundles_post_ra>
